<compile_context>
chip_gen: v5e
topology: v5e:2x2
jax: 0.10.0
libtpu: 0.0.40
codegen_flags: <defaults>
</compile_context>

<pallas_src>
import functools

import jax
import jax.numpy as jnp
from jax import lax
from jax.experimental import pallas as pl
from jax.experimental.pallas import tpu as pltpu

_LANES = 128


def _ceil_div(a, b):
    return -(-a // b)


def _round_up(x, m):
    return ((x + m - 1) // m) * m


def _num_tensorcores():
    """Best-effort TensorCore count per JAX device for the 'parallel' axis."""
    try:
        kind = str(getattr(jax.devices()[0], "device_kind", "")).lower()
    except Exception:
        return 1
    # Single-TensorCore JAX devices: v2/v3 (one TC per device), v5e, v6e.
    if any(s in kind for s in ("v2", "v3", "v5 lite", "v5e", "v6 lite", "v6e")):
        return 1
    # v4 / v5p megacore and v7x expose 2 TensorCores per device.
    return 2


def _wpm_loss_kernel(yr_ref, yi_ref, yrh_ref, yih_ref, out_ref, *,
                     weight, rows, steps):
    p = pl.program_id(0)
    j = pl.program_id(1)

    @pl.when(j == 0)
    def _():
        out_ref[...] = jnp.zeros_like(out_ref)

    yr = yr_ref[...].astype(jnp.float32)
    yi = yi_ref[...].astype(jnp.float32)
    yrh = yrh_ref[...].astype(jnp.float32)
    yih = yih_ref[...].astype(jnp.float32)

    mag2 = yr * yr + yi * yi
    magh2 = yrh * yrh + yih * yih
    mag = jnp.sqrt(mag2)        # EUP
    mag_hat = jnp.sqrt(magh2)   # EUP
    dif_mag = mag_hat - mag

    # Unit phasor of the prediction; atan2(0,0)==0 -> (1, 0).  Safe denominator
    # (reciprocal of where(.., mag_hat, 1)) keeps the discarded branch finite.
    hat_pos = magh2 > 0.0
    inv_magh = pl.reciprocal(jnp.where(hat_pos, mag_hat, 1.0), approx=True)  # EUP
    uhr = jnp.where(hat_pos, yrh * inv_magh, 1.0)
    uhi = yih * inv_magh        # yih == 0 whenever mag_hat == 0

    # dif_theta^2 = mag^2 * |e^{i*th_hat} - e^{i*th}|^2
    #             = (mag*uhr - yr)^2 + (mag*uhi - yi)^2
    dr = mag * uhr - yr
    di = mag * uhi - yi
    term = dif_mag * dif_mag + weight * (dr * dr + di * di)

    tm = term.shape[0]
    base = (p * steps + j) * tm

    def _accumulate(t):
        # Fold (tm,128) -> (8,128) with pure VPU adds; cross-lane reduction is
        # deferred to the wrapper (lane-dense output, no in-kernel XLU/scalar).
        out_ref[...] += t.reshape(tm // 8, 8, _LANES).sum(axis=0)

    @pl.when(base + tm <= rows)
    def _():                     # fully in-bounds tile (common case, no mask)
        _accumulate(term)

    @pl.when(base + tm > rows)
    def _():                     # tile overhangs the slab: mask garbage rows
        row_ids = base + lax.broadcasted_iota(jnp.int32, term.shape, 0)
        _accumulate(jnp.where(row_ids < rows, term, 0.0))


def wpm_loss(y_real, y_imag, y_real_hat, y_imag_hat, weight):
    """Pallas TPU implementation of WPMLoss.forward (returns scalar f32)."""
    args = (y_real, y_imag, y_real_hat, y_imag_hat)
    n_elems = y_real.size

    # Per-array storage dtype: 16-bit floats stay narrow, everything else f32.
    def _slab_dtype(dt):
        dt = jnp.dtype(dt)
        return dt if dt.itemsize == 2 else jnp.dtype(jnp.float32)

    dtypes = [_slab_dtype(a.dtype) for a in args]
    sub = max(16 if dt.itemsize == 2 else 8 for dt in dtypes)      # sublane pack
    max_tm = 2048 if all(dt.itemsize == 2 for dt in dtypes) else 1024  # 512 KiB/blk

    rows = _ceil_div(n_elems, _LANES)

    ncores = _num_tensorcores()
    if rows < ncores * sub * 2:      # not worth splitting tiny inputs
        ncores = 1

    # Re-balanced tiling: pick the step count first, then the tile size, so
    # overhang is bounded by ~ncores*sub rows (not a whole MAX_TM tile).
    steps = max(1, _ceil_div(rows, ncores * max_tm))
    tm = max(sub, _round_up(_ceil_div(rows, ncores * steps), sub))
    slab_rows = max(rows, tm)        # only the single-tile case pads rows up
    nblocks = _ceil_div(slab_rows, tm)
    padded = slab_rows * _LANES

    def to_slab(x, dt):
        flat = jnp.ravel(x).astype(dt)
        if flat.size != padded:
            # TODO(synk): this pad is an extra HBM copy; it is only hit when
            # n_elems is not a multiple of 128 (or the input is tiny).  Zero
            # padding is exactly loss-neutral (term(0,0,0,0)==0); rows beyond
            # the slab are masked in-kernel.
            flat = jnp.pad(flat, (0, padded - flat.size))
        return flat.reshape(slab_rows, _LANES)   # zero-copy when aligned

    slabs = [to_slab(a, dt) for a, dt in zip(args, dtypes)]

    # Clamp the block index so no DMA ever starts past the slab; overhanging
    # tiles re-read the last block and are fully masked in the kernel.
    def in_index(p, j):
        return (jnp.minimum(p * steps + j, nblocks - 1), 0)

    in_specs = [pl.BlockSpec((tm, _LANES), in_index) for _ in range(4)]
    out_spec = pl.BlockSpec((8, _LANES), lambda p, j: (p, 0))

    kernel = functools.partial(_wpm_loss_kernel, weight=float(weight),
                               rows=slab_rows, steps=steps)

    partial_sums = pl.pallas_call(
        kernel,
        out_shape=jax.ShapeDtypeStruct((ncores * 8, _LANES), jnp.float32),
        grid_spec=pltpu.PrefetchScalarGridSpec(
            num_scalar_prefetch=0,
            grid=(ncores, steps),
            in_specs=in_specs,
            out_specs=out_spec,
        ),
        compiler_params=pltpu.CompilerParams(
            dimension_semantics=("parallel", "arbitrary"),
            vmem_limit_bytes=32 * 1024 * 1024,
        ),
    )(*slabs)

    # TODO(synk): the PyTorch module raises / dumps .npy files when the loss is
    # NaN; data-dependent host side-effects are not expressible inside jit, so
    # that check is omitted (callers can jnp.isnan the returned scalar).
    return jnp.sum(partial_sums) / jnp.float32(n_elems)


def _reference(y_real, y_imag, y_real_hat, y_imag_hat, weight):
    mag = jnp.sqrt(y_real ** 2 + y_imag ** 2)
    mag_hat = jnp.sqrt(y_real_hat ** 2 + y_imag_hat ** 2)
    theta = jnp.arctan2(y_imag, y_real)
    theta_hat = jnp.arctan2(y_imag_hat, y_real_hat)
    dif_theta = 2.0 * mag * jnp.sin((theta_hat - theta) / 2.0)
    dif_mag = mag_hat - mag
    return jnp.mean(dif_mag ** 2 + weight * dif_theta ** 2)


if __name__ == "__main__":
    key = jax.random.PRNGKey(0)
    weight = 0.5                     # deterministic loss weight

    # approx=True reciprocal (EUP) has ~12-bit mantissa accuracy, so validate
    # against the atan2/sin reference at a relaxed tolerance.
    RTOL, ATOL = 5e-3, 1e-5

    # 1) Main case: f32, 128-divisible size (zero-copy slab path).
    k1, k2, k3, k4 = jax.random.split(key, 4)
    shape = (2, 4, 16, 16)           # (batch, channels, H, W)
    y_real = jax.random.normal(k1, shape, dtype=jnp.float32)
    y_imag = jax.random.normal(k2, shape, dtype=jnp.float32)
    y_real_hat = jax.random.normal(k3, shape, dtype=jnp.float32)
    y_imag_hat = jax.random.normal(k4, shape, dtype=jnp.float32)

    loss = wpm_loss(y_real, y_imag, y_real_hat, y_imag_hat, weight)
    jax.block_until_ready(loss)
    ref = _reference(y_real, y_imag, y_real_hat, y_imag_hat, weight)
    assert jnp.isfinite(loss)
    assert jnp.allclose(loss, ref, rtol=RTOL, atol=ATOL), (loss, ref)

    # 2) Non-128-divisible f32 size (exercises the in-kernel tail mask).
    k5, k6, k7, k8 = jax.random.split(jax.random.PRNGKey(1), 4)
    shape2 = (2, 4, 33, 21)
    a = jax.random.normal(k5, shape2, dtype=jnp.float32)
    b = jax.random.normal(k6, shape2, dtype=jnp.float32)
    c = jax.random.normal(k7, shape2, dtype=jnp.float32)
    d = jax.random.normal(k8, shape2, dtype=jnp.float32)
    loss2 = wpm_loss(a, b, c, d, weight)
    jax.block_until_ready(loss2)
    ref2 = _reference(a, b, c, d, weight)
    assert jnp.allclose(loss2, ref2, rtol=RTOL, atol=ATOL), (loss2, ref2)

    # 3) bf16 inputs, odd size (narrow slabs kept in bf16, upcast in-kernel).
    k9, k10, k11, k12 = jax.random.split(jax.random.PRNGKey(2), 4)
    shape3 = (3, 5, 7)
    e = jax.random.normal(k9, shape3, dtype=jnp.bfloat16)
    f = jax.random.normal(k10, shape3, dtype=jnp.bfloat16)
    g = jax.random.normal(k11, shape3, dtype=jnp.bfloat16)
    h = jax.random.normal(k12, shape3, dtype=jnp.bfloat16)
    loss3 = wpm_loss(e, f, g, h, weight)
    jax.block_until_ready(loss3)
    ref3 = _reference(e.astype(jnp.float32), f.astype(jnp.float32),
                      g.astype(jnp.float32), h.astype(jnp.float32), weight)
    assert jnp.allclose(loss3, ref3, rtol=RTOL, atol=ATOL), (loss3, ref3)

    print("KERNEL_OK")
</pallas_src>

<mosaic_0001>
module attributes {stable_mosaic.version = 11 : i64} {
  func.func @_wpm_loss_kernel(%arg0: i32, %arg1: i32, %arg2: memref<16x128xf32, #tpu.memory_space<vmem>>, %arg3: memref<16x128xf32, #tpu.memory_space<vmem>>, %arg4: memref<16x128xf32, #tpu.memory_space<vmem>>, %arg5: memref<16x128xf32, #tpu.memory_space<vmem>>, %arg6: memref<8x128xf32, #tpu.memory_space<vmem>>) attributes {dimension_semantics = [#tpu.dimension_semantics<parallel>, #tpu.dimension_semantics<arbitrary>], iteration_bounds = array<i64: 1, 1>, scalar_prefetch = 0 : i64, scratch_operands = 0 : i64, tpu.core_type = #tpu.core_type<tc>, window_params = [{transform_indices = @transform_0, window_bounds = array<i64: 16, 128>}, {transform_indices = @transform_1, window_bounds = array<i64: 16, 128>}, {transform_indices = @transform_2, window_bounds = array<i64: 16, 128>}, {transform_indices = @transform_3, window_bounds = array<i64: 16, 128>}, {transform_indices = @transform_4, window_bounds = array<i64: 8, 128>}]} {
    %c0_i32 = arith.constant 0 : i32
    %0 = arith.cmpi eq, %arg1, %c0_i32 : i32
    %1 = arith.extui %0 : i1 to i32
    %c0_i32_0 = arith.constant 0 : i32
    %2 = arith.cmpi ne, %1, %c0_i32_0 : i32
    scf.if %2 {
      %cst_17 = arith.constant 0.000000e+00 : f32
      %47 = vector.broadcast %cst_17 : f32 to vector<8x128xf32>
      %c0_18 = arith.constant 0 : index
      %c0_19 = arith.constant 0 : index
      %48 = vector.load %arg6[%c0_18, %c0_19] : memref<8x128xf32, #tpu.memory_space<vmem>>, vector<8x128xf32>
      tpu.vector_store %arg6[%c0_18, %c0_19], %47 {strides = array<i32>} : memref<8x128xf32, #tpu.memory_space<vmem>>, vector<8x128xf32>,
    } else {
    }
    %c0 = arith.constant 0 : index
    %c0_1 = arith.constant 0 : index
    %3 = vector.load %arg2[%c0, %c0_1] : memref<16x128xf32, #tpu.memory_space<vmem>>, vector<16x128xf32>
    %c0_2 = arith.constant 0 : index
    %c0_3 = arith.constant 0 : index
    %4 = vector.load %arg3[%c0_2, %c0_3] : memref<16x128xf32, #tpu.memory_space<vmem>>, vector<16x128xf32>
    %c0_4 = arith.constant 0 : index
    %c0_5 = arith.constant 0 : index
    %5 = vector.load %arg4[%c0_4, %c0_5] : memref<16x128xf32, #tpu.memory_space<vmem>>, vector<16x128xf32>
    %c0_6 = arith.constant 0 : index
    %c0_7 = arith.constant 0 : index
    %6 = vector.load %arg5[%c0_6, %c0_7] : memref<16x128xf32, #tpu.memory_space<vmem>>, vector<16x128xf32>
    %7 = arith.mulf %3, %3 : vector<16x128xf32>
    %8 = arith.mulf %4, %4 : vector<16x128xf32>
    %9 = arith.addf %7, %8 : vector<16x128xf32>
    %10 = arith.mulf %5, %5 : vector<16x128xf32>
    %11 = arith.mulf %6, %6 : vector<16x128xf32>
    %12 = arith.addf %10, %11 : vector<16x128xf32>
    %13 = math.sqrt %9 : vector<16x128xf32>
    %14 = math.sqrt %12 : vector<16x128xf32>
    %15 = arith.subf %14, %13 : vector<16x128xf32>
    %cst = arith.constant 0.000000e+00 : f32
    %16 = vector.broadcast %cst : f32 to vector<16x128xf32>
    %17 = arith.cmpf ogt, %12, %16 : vector<16x128xf32>
    %cst_8 = arith.constant 1.000000e+00 : f32
    %18 = vector.broadcast %cst_8 : f32 to vector<16x128xf32>
    %19 = arith.select %17, %14, %18 : vector<16x128xi1>, vector<16x128xf32>
    %20 = tpu.reciprocal %19 {approx = true} : vector<16x128xf32> -> vector<16x128xf32>
    %21 = arith.mulf %5, %20 : vector<16x128xf32>
    %cst_9 = arith.constant 1.000000e+00 : f32
    %22 = vector.broadcast %cst_9 : f32 to vector<16x128xf32>
    %23 = arith.select %17, %21, %22 : vector<16x128xi1>, vector<16x128xf32>
    %24 = arith.mulf %6, %20 : vector<16x128xf32>
    %25 = arith.mulf %13, %23 : vector<16x128xf32>
    %26 = arith.subf %25, %3 : vector<16x128xf32>
    %27 = arith.mulf %13, %24 : vector<16x128xf32>
    %28 = arith.subf %27, %4 : vector<16x128xf32>
    %29 = arith.mulf %15, %15 : vector<16x128xf32>
    %30 = arith.mulf %26, %26 : vector<16x128xf32>
    %31 = arith.mulf %28, %28 : vector<16x128xf32>
    %32 = arith.addf %30, %31 : vector<16x128xf32>
    %cst_10 = arith.constant 5.000000e-01 : f32
    %33 = vector.broadcast %cst_10 : f32 to vector<16x128xf32>
    %34 = arith.mulf %33, %32 : vector<16x128xf32>
    %35 = arith.addf %29, %34 : vector<16x128xf32>
    %c1_i32 = arith.constant 1 : i32
    %36 = arith.muli %arg0, %c1_i32 : i32
    %37 = arith.addi %36, %arg1 : i32
    %c16_i32 = arith.constant 16 : i32
    %38 = arith.muli %37, %c16_i32 : i32
    %c16_i32_11 = arith.constant 16 : i32
    %39 = arith.addi %38, %c16_i32_11 : i32
    %c16_i32_12 = arith.constant 16 : i32
    %40 = arith.cmpi sle, %39, %c16_i32_12 : i32
    %41 = arith.extui %40 : i1 to i32
    %c0_i32_13 = arith.constant 0 : i32
    %42 = arith.cmpi ne, %41, %c0_i32_13 : i32
    scf.if %42 {
      %c0_17 = arith.constant 0 : index
      %c0_18 = arith.constant 0 : index
      %47 = vector.load %arg6[%c0_17, %c0_18] : memref<8x128xf32, #tpu.memory_space<vmem>>, vector<8x128xf32>
      %48 = vector.shape_cast %35 : vector<16x128xf32> to vector<2x8x128xf32>
      %cst_19 = arith.constant dense<0.000000e+00> : vector<8x128xf32>
      %49 = vector.multi_reduction <add>, %48, %cst_19 [0] : vector<2x8x128xf32> to vector<8x128xf32>
      %50 = arith.addf %47, %49 : vector<8x128xf32>
      %c0_20 = arith.constant 0 : index
      %c0_21 = arith.constant 0 : index
      %51 = vector.load %arg6[%c0_20, %c0_21] : memref<8x128xf32, #tpu.memory_space<vmem>>, vector<8x128xf32>
      tpu.vector_store %arg6[%c0_20, %c0_21], %50 {strides = array<i32>} : memref<8x128xf32, #tpu.memory_space<vmem>>, vector<8x128xf32>,
    } else {
    }
    %c16_i32_14 = arith.constant 16 : i32
    %43 = arith.addi %38, %c16_i32_14 : i32
    %c16_i32_15 = arith.constant 16 : i32
    %44 = arith.cmpi sgt, %43, %c16_i32_15 : i32
    %45 = arith.extui %44 : i1 to i32
    %c0_i32_16 = arith.constant 0 : i32
    %46 = arith.cmpi ne, %45, %c0_i32_16 : i32
    scf.if %46 {
      %47 = tpu.iota {dimensions = array<i32: 0>} : vector<16x128xi32>
      %48 = vector.broadcast %38 : i32 to vector<16x128xi32>
      %49 = arith.addi %48, %47 : vector<16x128xi32>
      %c16_i32_17 = arith.constant 16 : i32
      %50 = vector.broadcast %c16_i32_17 : i32 to vector<16x128xi32>
      %51 = arith.cmpi slt, %49, %50 : vector<16x128xi32>
      %cst_18 = arith.constant 0.000000e+00 : f32
      %52 = vector.broadcast %cst_18 : f32 to vector<16x128xf32>
      %53 = arith.select %51, %35, %52 : vector<16x128xi1>, vector<16x128xf32>
      %c0_19 = arith.constant 0 : index
      %c0_20 = arith.constant 0 : index
      %54 = vector.load %arg6[%c0_19, %c0_20] : memref<8x128xf32, #tpu.memory_space<vmem>>, vector<8x128xf32>
      %55 = vector.shape_cast %53 : vector<16x128xf32> to vector<2x8x128xf32>
      %cst_21 = arith.constant dense<0.000000e+00> : vector<8x128xf32>
      %56 = vector.multi_reduction <add>, %55, %cst_21 [0] : vector<2x8x128xf32> to vector<8x128xf32>
      %57 = arith.addf %54, %56 : vector<8x128xf32>
      %c0_22 = arith.constant 0 : index
      %c0_23 = arith.constant 0 : index
      %58 = vector.load %arg6[%c0_22, %c0_23] : memref<8x128xf32, #tpu.memory_space<vmem>>, vector<8x128xf32>
      tpu.vector_store %arg6[%c0_22, %c0_23], %57 {strides = array<i32>} : memref<8x128xf32, #tpu.memory_space<vmem>>, vector<8x128xf32>,
    } else {
    }
    return
  }
  func.func @transform_0(%arg0: i32, %arg1: i32) -> (i32, i32) {
    %c1_i32 = arith.constant 1 : i32
    %0 = arith.muli %arg0, %c1_i32 : i32
    %1 = arith.addi %0, %arg1 : i32
    %c0_i32 = arith.constant 0 : i32
    %2 = arith.minsi %1, %c0_i32 : i32
    %c0_i32_0 = arith.constant 0 : i32
    %c0_i32_1 = arith.constant 0 : i32
    return %2, %c0_i32_0 : i32, i32
  }
  func.func @transform_1(%arg0: i32, %arg1: i32) -> (i32, i32) {
    %c1_i32 = arith.constant 1 : i32
    %0 = arith.muli %arg0, %c1_i32 : i32
    %1 = arith.addi %0, %arg1 : i32
    %c0_i32 = arith.constant 0 : i32
    %2 = arith.minsi %1, %c0_i32 : i32
    %c0_i32_0 = arith.constant 0 : i32
    %c0_i32_1 = arith.constant 0 : i32
    return %2, %c0_i32_0 : i32, i32
  }
  func.func @transform_2(%arg0: i32, %arg1: i32) -> (i32, i32) {
    %c1_i32 = arith.constant 1 : i32
    %0 = arith.muli %arg0, %c1_i32 : i32
    %1 = arith.addi %0, %arg1 : i32
    %c0_i32 = arith.constant 0 : i32
    %2 = arith.minsi %1, %c0_i32 : i32
    %c0_i32_0 = arith.constant 0 : i32
    %c0_i32_1 = arith.constant 0 : i32
    return %2, %c0_i32_0 : i32, i32
  }
  func.func @transform_3(%arg0: i32, %arg1: i32) -> (i32, i32) {
    %c1_i32 = arith.constant 1 : i32
    %0 = arith.muli %arg0, %c1_i32 : i32
    %1 = arith.addi %0, %arg1 : i32
    %c0_i32 = arith.constant 0 : i32
    %2 = arith.minsi %1, %c0_i32 : i32
    %c0_i32_0 = arith.constant 0 : i32
    %c0_i32_1 = arith.constant 0 : i32
    return %2, %c0_i32_0 : i32, i32
  }
  func.func @transform_4(%arg0: i32, %arg1: i32) -> (i32, i32) {
    %c0_i32 = arith.constant 0 : i32
    %c0_i32_0 = arith.constant 0 : i32
    return %arg0, %c0_i32 : i32, i32
  }
}

</mosaic_0001>

<bundles_post_ra>
// kernel: tpu_custom_call.1
= control target key start
LH: loop header
LB: loop body
LE: loop exit
PB: predicated region body
PF: predicated region fallthrough
CT: control target
= control target key end

     0   :  { %9 = vsyncpa [#allocation3], 0  ;;  %s565_s0 = inlined_call_operand.hbm [shape: f32[16,128], index: 0, kind: input, shape index: {}]   ;;  %s566_s1 = inlined_call_operand.hbm [shape: f32[16,128], index: 1, kind: input, shape index: {}]   ;;  %s567_s2 = inlined_call_operand.hbm [shape: f32[16,128], index: 2, kind: input, shape index: {}]   ;;  %s568_s3 = inlined_call_operand.hbm [shape: f32[16,128], index: 3, kind: input, shape index: {}]   ;;  %s569_s4 = inlined_call_operand.hbm [shape: f32[8,128], index: 4, kind: output, shape index: {}]  }
   0x1   :  { %10 = vsyncpa [#allocation6], 0 }
   0x2   :  { %11 = vsyncpa [#allocation9], 0 }
   0x3   :  { %12 = vsyncpa [#allocation4], 0  ;;  %s42_s17 = sshll.u32 %s566_s1, 4  ;;  %s432_s18 = smov [#allocation5]   ;;  %s43_s17 = int_to_ptr.hbm [resolvable:$true] %s42_s17 }
   0x4   :  { %s44_s19 = sshll.u32 %s432_s18, 4  ;;  %s23_s22 = sshll.u32 %s565_s0, 4  ;;  %s45_s19 = int_to_ptr.vmem [resolvable:$true] %s44_s19  ;;  %s24_s22 = int_to_ptr.hbm [resolvable:$true] %s23_s22 }
   0x5   :  { %s433_s23 = smov 128   ;;  %s434_s24 = smov 8  }
   0x6   :  { %50 = dma.hbm_to_vmem [thread:$0]  %s43_s17, 256, %s45_s19, [#allocation6], %s433_s23, %s433_s23, %s434_s24  }
   0x7   :  { %s435_s25 = smov [#allocation2]   ;;  %s61_s29 = sshll.u32 %s567_s2, 4  ;;  %s62_s29 = int_to_ptr.hbm [resolvable:$true] %s61_s29 }
   0x8   :  { %s25_s26 = sshll.u32 %s435_s25, 4  ;;  %s80_s5 = sshll.u32 %s568_s3, 4  ;;  %s26_s26 = int_to_ptr.vmem [resolvable:$true] %s25_s26  ;;  %s81_s5 = int_to_ptr.hbm [resolvable:$true] %s80_s5 }
   0x9   :  { %31 = dma.hbm_to_vmem [thread:$0]  %s24_s22, 256, %s26_s26, [#allocation3], %s433_s23, %s433_s23, %s434_s24  }
   0xa   :  { %s436_s6 = smov [#allocation7]   ;;  %s437_s0 = smov [#allocation8]  }
   0xb   :  { %s63_s7 = sshll.u32 %s436_s6, 4  ;;  %s82_s8 = sshll.u32 %s437_s0, 4  ;;  %s64_s7 = int_to_ptr.vmem [resolvable:$true] %s63_s7  ;;  %s83_s8 = int_to_ptr.vmem [resolvable:$true] %s82_s8 }
   0xc   :  { %69 = dma.hbm_to_vmem [thread:$0]  %s62_s29, 256, %s64_s7, [#allocation6], %s433_s23, %s433_s23, %s434_s24  }
   0xd   :  { %88 = dma.hbm_to_vmem [thread:$0]  %s81_s5, 256, %s83_s8, [#allocation9], %s433_s23, %s433_s23, %s434_s24  }
   0xe   :  { %424 = dma.done.wait [#allocation3], 256  }
   0xf   :  { %425 = vsyncadd [#allocation3], 4294967040 }
  0x10   :  { %426 = dma.done.wait [#allocation6], 512  }
  0x11   :  { %427 = vsyncadd [#allocation6], 4294966784 }
  0x12   :  { %428 = dma.done.wait [#allocation9], 256  }
  0x13   :  { %429 = vsyncadd [#allocation9], 4294967040  ;;  %v476_v0 = vld [vmem:[#allocation2] sm:$0xff]  ;;  %v478_v1 = vld [vmem:[#allocation2 + $0x8] sm:$0xff]  ;;  %s438_s2 = smov [#allocation10]   ;;  %s264_s11 = sshll.u32 %s569_s4, 4  ;;  %s265_s11 = int_to_ptr.hbm [resolvable:$true] %s264_s11 }
  0x14   :  { %v480_v2 = vld [vmem:[#allocation5] sm:$0xff]  ;;  %v482_v3 = vld [vmem:[#allocation5 + $0x8] sm:$0xff]  ;;  %v484_v4 = vld [vmem:[#allocation7] sm:$0xff]  ;;  %v134_v6 = vmul.f32 %v476_v0, %v476_v0  ;;  %v135_v7 = vmul.f32 %v478_v1, %v478_v1  ;;  %s262_s3 = sshll.u32 %s438_s2, 4  ;;  %s263_s3 = int_to_ptr.vmem [resolvable:$true] %s262_s3 }
  0x15   :  { %v486_v5 = vld [vmem:[#allocation7 + $0x8] sm:$0xff]  ;;  %v136_v8 = vmul.f32 %v480_v2, %v480_v2  ;;  %v494_v9 = vld [vmem:[#allocation8] sm:$0xff]  ;;  %v496_v10 = vld [vmem:[#allocation8 + $0x8] sm:$0xff]  ;;  %v137_v11 = vmul.f32 %v482_v3, %v482_v3  ;;  %v140_v12 = vmul.f32 %v484_v4, %v484_v4 }
  0x16   :  { %v141_v13 = vmul.f32 %v486_v5, %v486_v5  ;;  %v142_v15 = vmul.f32 %v494_v9, %v494_v9  ;;  %v143_v16 = vmul.f32 %v496_v10, %v496_v10 }
  0x17   :  { %v504_v14 = vadd.f32 %v136_v8, %v134_v6  ;;  %v510_v17 = vadd.f32 %v137_v11, %v135_v7 }
  0x18   :  { %v512_v18 = vadd.f32 %v142_v15, %v140_v12  ;;  %v514_v19 = vadd.f32 %v143_v16, %v141_v13 }
  0x19   :  { %292 = vrsqrt.f32 %v504_v14  ;;  %vm153_vm6 = vcmp.eq.f32.partialorder %v504_v14, inf  ;;  %vm165_vm7 = vcmp.eq.f32.partialorder %v510_v17, inf  ;;  %v156_v56 = vand.u32 2147483648, %v504_v14 }
  0x1a   :  { %294 = vrsqrt.f32 %v510_v17  ;;  %vm177_vm0 = vcmp.eq.f32.partialorder %v512_v18, inf  ;;  %vm179_vm1 = vcmp.eq.f32.partialorder %v512_v18, 0.0  ;;  %v180_v41 = vand.u32 2147483648, %v512_v18 }
  0x1b   :  { %296 = vrsqrt.f32 %v512_v18  ;;  %vm189_vm2 = vcmp.eq.f32.partialorder %v514_v19, inf  ;;  %v192_v45 = vand.u32 2147483648, %v514_v19  ;;  %vm191_vm3 = vcmp.eq.f32.partialorder %v514_v19, 0.0 }
  0x1c   :  { %298 = vrsqrt.f32 %v514_v19  ;;  %vm196_vm4 = vcmp.gt.f32.partialorder %v512_v18, 0.0  ;;  %vm197_vm5 = vcmp.gt.f32.partialorder %v514_v19, 0.0  ;;  %vm155_vm8 = vcmp.eq.f32.partialorder %v504_v14, 0.0 }
  0x1d   :  { %v168_v58 = vand.u32 2147483648, %v510_v17  ;;  %vm167_vm9 = vcmp.eq.f32.partialorder %v510_v17, 0.0 }
  0x1f   :  { %v293_v20 = vpop.eup %292 }
  0x20   :  { %v295_v21 = vpop.eup %294  ;;  %v147_v22 = vmul.f32 %v293_v20, %v504_v14 }
  0x21   :  { %v297_v23 = vpop.eup %296  ;;  %v159_v24 = vmul.f32 %v295_v21, %v510_v17 }
  0x22   :  { %v299_v25 = vpop.eup %298  ;;  %v148_v26 = vmul.f32 %v293_v20, %v147_v22  ;;  %v171_v27 = vmul.f32 %v297_v23, %v512_v18 }
  0x23   :  { %v160_v28 = vmul.f32 %v295_v21, %v159_v24  ;;  %v183_v29 = vmul.f32 %v299_v25, %v514_v19 }
  0x24   :  { %v149_v30 = vmul.f32 0.5, %v148_v26  ;;  %v172_v31 = vmul.f32 %v297_v23, %v171_v27 }
  0x25   :  { %v161_v32 = vmul.f32 0.5, %v160_v28  ;;  %v184_v33 = vmul.f32 %v299_v25, %v183_v29 }
  0x26   :  { %v173_v34 = vmul.f32 0.5, %v172_v31  ;;  %v150_v36 = vsub.f32 1.5, %v149_v30 }
  0x27   :  { %v185_v35 = vmul.f32 0.5, %v184_v33  ;;  %v162_v38 = vsub.f32 1.5, %v161_v32 }
  0x28   :  { %v174_v37 = vsub.f32 1.5, %v173_v34  ;;  %v151_v43 = vmul.f32 %v293_v20, %v150_v36 }
  0x29   :  { %v186_v39 = vsub.f32 1.5, %v185_v35  ;;  %v163_v46 = vmul.f32 %v295_v21, %v162_v38 }
  0x2a   :  { %v175_v40 = vmul.f32 %v297_v23, %v174_v37  ;;  %v152_v51 = vmul.f32 %v151_v43, %v504_v14 }
  0x2b   :  { %v187_v42 = vmul.f32 %v299_v25, %v186_v39  ;;  %v164_v54 = vmul.f32 %v163_v46, %v510_v17 }
  0x2c   :  { %v176_v44 = vmul.f32 %v175_v40, %v512_v18  ;;  %v154_v57 = vsel %vm153_vm6, %v504_v14, %v152_v51 }
  0x2d   :  { %v188_v47 = vmul.f32 %v187_v42, %v514_v19  ;;  %v166_v59 = vsel %vm165_vm7, %v510_v17, %v164_v54  ;;  %v157_v61 = vsel %vm155_vm8, %v156_v56, %v154_v57 }
  0x2e   :  { %v178_v48 = vsel %vm177_vm0, %v512_v18, %v176_v44  ;;  %v169_v63 = vsel %vm167_vm9, %v168_v58, %v166_v59 }
  0x2f   :  { %v181_v49 = vsel %vm179_vm1, %v180_v41, %v178_v48  ;;  %v190_v50 = vsel %vm189_vm2, %v514_v19, %v188_v47 }
  0x30   :  { %v193_v52 = vsel %vm191_vm3, %v192_v45, %v190_v50  ;;  %v198_v53 = vsel %vm196_vm4, %v181_v49, 1.0  ;;  %v194_v21 = vsub.f32 %v181_v49, %v157_v61 }
  0x31   :  { %v199_v55 = vsel %vm197_vm5, %v193_v52, 1.0  ;;  %300 = vrcp.f32 %v198_v53 }
  0x32   :  { %302 = vrcp.f32 %v199_v55  ;;  %v216_v25 = vmul.f32 %v194_v21, %v194_v21 }
  0x37   :  { %v301_v60 = vpop.eup %300 }
  0x38   :  { %v303_v62 = vpop.eup %302  ;;  %v202_v6 = vmul.f32 %v301_v60, %v484_v4  ;;  %v206_v7 = vmul.f32 %v301_v60, %v494_v9 }
  0x39   :  { %v203_v8 = vmul.f32 %v303_v62, %v486_v5  ;;  %v207_v11 = vmul.f32 %v303_v62, %v496_v10  ;;  %v195_v5 = vsub.f32 %v193_v52, %v169_v63 }
  0x3a   :  { %v204_v12 = vsel %vm196_vm4, %v202_v6, 1.0  ;;  %v212_v13 = vmul.f32 %v206_v7, %v157_v61 }
  0x3b   :  { %v205_v14 = vsel %vm197_vm5, %v203_v8, 1.0  ;;  %v208_v15 = vmul.f32 %v204_v12, %v157_v61  ;;  %v213_v16 = vmul.f32 %v207_v11, %v169_v63  ;;  %v217_v26 = vmul.f32 %v195_v5, %v195_v5 }
  0x3c   :  { %v209_v17 = vmul.f32 %v205_v14, %v169_v63  ;;  %v214_v20 = vsub.f32 %v212_v13, %v480_v2 }
  0x3d   :  { %v210_v4 = vsub.f32 %v208_v15, %v476_v0  ;;  %v215_v9 = vsub.f32 %v213_v16, %v482_v3 }
  0x3e   :  { %v211_v10 = vsub.f32 %v209_v17, %v478_v1  ;;  %v220_v22 = vmul.f32 %v214_v20, %v214_v20 }
  0x3f   :  { %v218_v18 = vmul.f32 %v210_v4, %v210_v4  ;;  %v221_v23 = vmul.f32 %v215_v9, %v215_v9 }
  0x40   :  { %v219_v24 = vmul.f32 %v211_v10, %v211_v10 }
  0x41   :  { %v222_v19 = vadd.f32 %v220_v22, %v218_v18 }
  0x42   :  { %v223_v27 = vadd.f32 %v221_v23, %v219_v24 }
  0x43   :  { %v224_v28 = vmul.f32 0.5, %v222_v19 }
  0x44   :  { %v225_v29 = vmul.f32 0.5, %v223_v27 }
  0x45   :  { %v226_v30 = vadd.f32 %v224_v28, %v216_v25 }
  0x46   :  { %v227_v2 = vadd.f32 %v225_v29, %v217_v26 }
  0x48   :  { %v236_v0 = vadd.f32 %v227_v2, %v226_v30 }
  0x4a   :  { %238 = vst [vmem:[#allocation10] sm:$0xff] %v236_v0 }
  0x4b   :  { %267 = dma.vmem_to_hbm [thread:$0]  %s263_s3, 128, %s265_s11, [#allocation4]  }
  0x4c   :  { %430 = dma.done.wait [#allocation4], 128  }
  0x4d   :  { %431 = vsyncadd [#allocation4], 4294967168 }
  0x4e   :  { %272 = vsyncpa [#allocation3], 1 }
  0x4f   :  { %273 = vsyncpa [#allocation6], 1 }
  0x50   :  { %274 = vsyncpa [#allocation9], 1 }
  0x51   :  { %275 = vsyncpa [#allocation4], 1 }

</bundles_post_ra>
